<compile_context>
chip_gen: v7x
topology: tpu7x:2x2x1
jax: 0.10.0
libtpu: 0.0.40
codegen_flags: <defaults>
</compile_context>

<pallas_src>
import functools

import jax
import jax.numpy as jnp
from jax.experimental import pallas as pl
from jax.experimental.pallas import tpu as pltpu


def _anls_rowsum_kernel(probs_ref, targets_ref, out_ref, *, epsilon,
                        inv_num_classes):
    """Per-tile kernel: out_ref (1, tb) <- per-sample AN-LS loss (already /C).

    probs_ref, targets_ref : (tb, C) VMEM tiles
    out_ref                : (1, tb) VMEM tile (lane-dense store)
    """
    p = probs_ref[...].astype(jnp.float32)
    t = targets_ref[...].astype(jnp.float32)

    # smoothed targets: t*(1-eps) + (1-t)*(eps/2) == eps/2 + t*(1 - 1.5*eps)
    st = (epsilon * 0.5) + t * (1.0 - 1.5 * epsilon)

    # clamp probabilities exactly as the reference does
    p = jnp.clip(p, 1e-7, 1.0 - 1e-7)
    logp = jnp.log(p)
    log1mp = jnp.log(1.0 - p)

    # -(st*log(p) + (1-st)*log(1-p)) == -(log1mp + st*(logp - log1mp))
    loss = -(log1mp + st * (logp - log1mp))

    # per-row sum, normalized by num_classes; write lane-dense (1, tb)
    row = jnp.sum(loss, axis=1) * inv_num_classes
    out_ref[...] = row[None, :]


def _pick_batch_tile(B, C, probs_dtype, targets_dtype):
    """Largest batch tile whose double-buffered working set stays under a
    conservative ~12 MiB budget (safe for v5e/v6e 128 MiB and v7x 64 MiB)."""
    bytes_per_row = (jnp.dtype(probs_dtype).itemsize
                     + jnp.dtype(targets_dtype).itemsize) * C
    budget = 12 * 1024 * 1024
    tb = budget // (2 * bytes_per_row)          # 2 pipeline buffers per input
    tb = int(max(8, min(tb, 2048, B)))
    if tb < B:
        if tb >= 128:
            tb = (tb // 128) * 128              # lane-dense output chunks
        else:
            tb = max(8, (tb // 8) * 8)          # sublane alignment (f32)
    return tb


def assume_negative_label_smoothing_loss(probabilities, targets, *,
                                         epsilon=0.1, reduction="mean",
                                         batch_tile=None):
    """AN-LS loss via Pallas.  probabilities/targets: (B, C)."""
    B, C = probabilities.shape
    assert targets.shape == (B, C)

    if batch_tile is None:
        tb = _pick_batch_tile(B, C, probabilities.dtype, targets.dtype)
    else:
        tb = int(min(batch_tile, B))
    n_tiles = pl.cdiv(B, tb)

    kernel = functools.partial(
        _anls_rowsum_kernel,
        epsilon=float(epsilon),
        inv_num_classes=1.0 / float(C))

    in_bytes = (probabilities.size * jnp.dtype(probabilities.dtype).itemsize
                + targets.size * jnp.dtype(targets.dtype).itemsize)
    cost = pl.CostEstimate(
        flops=8 * B * C,
        transcendentals=2 * B * C,
        bytes_accessed=in_bytes + n_tiles * tb * 4)

    partials = pl.pallas_call(
        kernel,
        out_shape=jax.ShapeDtypeStruct((n_tiles, tb), jnp.float32),
        grid_spec=pltpu.PrefetchScalarGridSpec(
            num_scalar_prefetch=0,
            grid=(n_tiles,),
            in_specs=[
                pl.BlockSpec((tb, C), lambda i: (i, 0)),
                pl.BlockSpec((tb, C), lambda i: (i, 0)),
            ],
            out_specs=pl.BlockSpec((1, tb), lambda i: (i, 0)),
        ),
        compiler_params=pltpu.CompilerParams(
            dimension_semantics=("parallel",),
            vmem_limit_bytes=32 * 1024 * 1024),
        cost_estimate=cost,
    )(probabilities, targets)

    # Drop padded tail rows (garbage) from the last (partial) tile, then finish.
    per_sample = partials.reshape(-1)[:B]
    if reduction == "mean":
        return jnp.mean(per_sample)
    elif reduction == "sum":
        return jnp.sum(per_sample)
    elif reduction == "none":
        return per_sample
    else:
        raise ValueError(f"unknown reduction {reduction!r}")


def _reference(probabilities, targets, epsilon=0.1, reduction="mean"):
    p = probabilities.astype(jnp.float32)
    t = targets.astype(jnp.float32)
    C = p.shape[1]
    st = t * (1 - epsilon) + (1 - t) * (epsilon / 2)
    p = jnp.clip(p, 1e-7, 1 - 1e-7)
    loss = -(st * jnp.log(p) + (1 - st) * jnp.log(1 - p))
    loss = loss.sum(axis=1) / C
    if reduction == "mean":
        return loss.mean()
    if reduction == "sum":
        return loss.sum()
    return loss


if __name__ == "__main__":
    key = jax.random.PRNGKey(0)
    k1, k2 = jax.random.split(key)

    ok = True

    # Small shapes consistent with the module (post-sigmoid multi-label preds).
    B, C = 16, 128
    logits = jax.random.normal(k1, (B, C), dtype=jnp.float32)
    probabilities = jax.nn.sigmoid(logits)
    targets = jax.random.bernoulli(k2, 0.3, (B, C)).astype(jnp.float32)

    for reduction in ("mean", "sum", "none"):
        out = assume_negative_label_smoothing_loss(
            probabilities, targets, epsilon=0.1, reduction=reduction)
        out = jax.block_until_ready(out)
        ref = _reference(probabilities, targets, epsilon=0.1, reduction=reduction)
        if not jnp.allclose(out, ref, rtol=1e-5, atol=1e-5):
            ok = False
            print(f"MISMATCH reduction={reduction}: {out} vs {ref}")

    # Exercise the multi-tile + ragged-batch path (B not divisible by the tile).
    B2 = 40
    k3, k4 = jax.random.split(k2)
    p2 = jax.nn.sigmoid(jax.random.normal(k3, (B2, C), dtype=jnp.float32))
    t2 = jax.random.bernoulli(k4, 0.3, (B2, C)).astype(jnp.float32)
    for reduction in ("mean", "sum", "none"):
        out = assume_negative_label_smoothing_loss(
            p2, t2, epsilon=0.1, reduction=reduction, batch_tile=16)
        out = jax.block_until_ready(out)
        ref = _reference(p2, t2, epsilon=0.1, reduction=reduction)
        if not jnp.allclose(out, ref, rtol=1e-5, atol=1e-5):
            ok = False
            print(f"MISMATCH ragged reduction={reduction}: {out} vs {ref}")

    if ok:
        print("KERNEL_OK")
</pallas_src>

<mosaic_0001>
module attributes {stable_mosaic.version = 11 : i64} {
  func.func @_anls_rowsum_kernel(%arg0: i32, %arg1: memref<16x128xf32, #tpu.memory_space<vmem>>, %arg2: memref<16x128xf32, #tpu.memory_space<vmem>>, %arg3: memref<1x16xf32, #tpu.memory_space<vmem>>) attributes {dimension_semantics = [#tpu.dimension_semantics<parallel>], iteration_bounds = array<i64: 1>, scalar_prefetch = 0 : i64, scratch_operands = 0 : i64, tpu.core_type = #tpu.core_type<tc>, window_params = [{transform_indices = @transform_0, window_bounds = array<i64: 16, 128>}, {transform_indices = @transform_1, window_bounds = array<i64: 16, 128>}, {transform_indices = @transform_2, window_bounds = array<i64: 1, 16>}]} {
    %c0 = arith.constant 0 : index
    %c0_0 = arith.constant 0 : index
    %0 = vector.load %arg1[%c0, %c0_0] : memref<16x128xf32, #tpu.memory_space<vmem>>, vector<16x128xf32>
    %c0_1 = arith.constant 0 : index
    %c0_2 = arith.constant 0 : index
    %1 = vector.load %arg2[%c0_1, %c0_2] : memref<16x128xf32, #tpu.memory_space<vmem>>, vector<16x128xf32>
    %cst = arith.constant 8.500000e-01 : f32
    %2 = vector.broadcast %cst : f32 to vector<16x128xf32>
    %3 = arith.mulf %1, %2 : vector<16x128xf32>
    %cst_3 = arith.constant 5.000000e-02 : f32
    %4 = vector.broadcast %cst_3 : f32 to vector<16x128xf32>
    %5 = arith.addf %4, %3 : vector<16x128xf32>
    %cst_4 = arith.constant 1.000000e-07 : f32
    %cst_5 = arith.constant 0.99999988 : f32
    %6 = vector.broadcast %cst_4 : f32 to vector<16x128xf32>
    %7 = arith.maximumf %6, %0 : vector<16x128xf32>
    %8 = vector.broadcast %cst_5 : f32 to vector<16x128xf32>
    %9 = arith.minimumf %8, %7 : vector<16x128xf32>
    %10 = math.log %9 : vector<16x128xf32>
    %cst_6 = arith.constant 1.000000e+00 : f32
    %11 = vector.broadcast %cst_6 : f32 to vector<16x128xf32>
    %12 = arith.subf %11, %9 : vector<16x128xf32>
    %13 = math.log %12 : vector<16x128xf32>
    %14 = arith.subf %10, %13 : vector<16x128xf32>
    %15 = arith.mulf %5, %14 : vector<16x128xf32>
    %16 = arith.addf %13, %15 : vector<16x128xf32>
    %cst_7 = arith.constant 0.000000e+00 : f32
    %17 = vector.broadcast %cst_7 : f32 to vector<16x128xf32>
    %18 = arith.subf %17, %16 : vector<16x128xf32>
    %cst_8 = arith.constant dense<0.000000e+00> : vector<16xf32>
    %19 = vector.multi_reduction <add>, %18, %cst_8 [1] : vector<16x128xf32> to vector<16xf32>
    %cst_9 = arith.constant 7.812500e-03 : f32
    %20 = vector.broadcast %cst_9 : f32 to vector<16xf32>
    %21 = arith.mulf %19, %20 : vector<16xf32>
    %22 = vector.shape_cast %21 : vector<16xf32> to vector<1x16xf32>
    %c0_10 = arith.constant 0 : index
    %c0_11 = arith.constant 0 : index
    %23 = vector.load %arg3[%c0_10, %c0_11] : memref<1x16xf32, #tpu.memory_space<vmem>>, vector<1x16xf32>
    tpu.vector_store %arg3[%c0_10, %c0_11], %22 {strides = array<i32>} : memref<1x16xf32, #tpu.memory_space<vmem>>, vector<1x16xf32>,
    return
  }
  func.func @transform_0(%arg0: i32) -> (i32, i32) {
    %c0_i32 = arith.constant 0 : i32
    %c0_i32_0 = arith.constant 0 : i32
    return %arg0, %c0_i32 : i32, i32
  }
  func.func @transform_1(%arg0: i32) -> (i32, i32) {
    %c0_i32 = arith.constant 0 : i32
    %c0_i32_0 = arith.constant 0 : i32
    return %arg0, %c0_i32 : i32, i32
  }
  func.func @transform_2(%arg0: i32) -> (i32, i32) {
    %c0_i32 = arith.constant 0 : i32
    %c0_i32_0 = arith.constant 0 : i32
    return %arg0, %c0_i32 : i32, i32
  }
}

</mosaic_0001>

<bundles_post_ra>
// kernel: tpu_custom_call.1
= control target key start
LH: loop header
LB: loop body
LE: loop exit
PB: predicated region body
PF: predicated region fallthrough
CT: control target
= control target key end

     0   :  { %7 = vsyncpa [#allocation3], 0  ;;  %s251_s0 = inlined_call_operand.hbm [shape: f32[16,128], index: 0, kind: input, shape index: {}]   ;;  %s252_s1 = inlined_call_operand.hbm [shape: f32[16,128], index: 1, kind: input, shape index: {}]   ;;  %s253_s2 = inlined_call_operand.hbm [shape: f32[1,16], index: 2, kind: output, shape index: {}]  }
   0x1   :  { %8 = vsyncpa [#allocation6], 0 }
   0x2   :  { %9 = vsyncpa [#allocation4], 0  ;;  %s195_s9 = smov [#allocation2]   ;;  %s123_s13 = scalar_lea.hbm %s251_s0, 256 }
   0x3   :  { %s15_s10 = sshll.u32 %s195_s9, 4  ;;  %p124_p0 = scmp.ne.s32.totalorder %s251_s0, %s123_s13  ;;  %s16_s10 = int_to_ptr.vmem [resolvable:$true] %s15_s10 }
   0x4   :  { %p127_p1 = scmp.lt.u32.totalorder %s123_s13, %s251_s0 }
   0x6   :  { %p129_p2 = pnand %p127_p1, %p124_p0 }
   0x8   :  { %132 = shalt.err (!%p129_p2)
}
   0x9   :  { %s133_s18 = scalar_lea.vmem %s16_s10, 256  ;;  %p138_p4 = scmp.lt.s32.totalorder %s16_s10, %s16_s10 }
   0xa   :  { %p134_p3 = scmp.ne.s32.totalorder %s16_s10, %s133_s18  ;;  %p139_p5 = scmp.lt.s32.totalorder %s133_s18, %s133_s18 }
   0xc   :  { %p140_p6 = por %p139_p5, %p138_p4 }
   0xe   :  { %p141_p7 = pnand %p140_p6, %p134_p3 }
  0x10   :  { %144 = shalt.err (!%p141_p7)
}
  0x11   :  { %s196_s19 = smov 128   ;;  %s197_s20 = smov 8  }
  0x12   :  { %21 = dma.hbm_to_vmem [thread:$0]  %s251_s0, 256, %s16_s10, [#allocation3], %s196_s19, %s196_s19, %s197_s20  }
  0x13   :  { %s198_s23 = smov [#allocation5]   ;;  %s145_s27 = scalar_lea.hbm %s252_s1, 256 }
  0x14   :  { %s27_s24 = sshll.u32 %s198_s23, 4  ;;  %p146_p8 = scmp.ne.s32.totalorder %s252_s1, %s145_s27  ;;  %s28_s24 = int_to_ptr.vmem [resolvable:$true] %s27_s24 }
  0x15   :  { %p149_p9 = scmp.lt.u32.totalorder %s145_s27, %s252_s1 }
  0x17   :  { %p151_p10 = pnand %p149_p9, %p146_p8 }
  0x19   :  { %154 = shalt.err (!%p151_p10)
}
  0x1a   :  { %s155_s4 = scalar_lea.vmem %s28_s24, 256  ;;  %p160_p12 = scmp.lt.s32.totalorder %s28_s24, %s28_s24 }
  0x1b   :  { %p156_p11 = scmp.ne.s32.totalorder %s28_s24, %s155_s4  ;;  %p161_p13 = scmp.lt.s32.totalorder %s155_s4, %s155_s4 }
  0x1d   :  { %p162_p0 = por %p161_p13, %p160_p12 }
  0x1f   :  { %p163_p1 = pnand %p162_p0, %p156_p11 }
  0x21   :  { %166 = shalt.err (!%p163_p1)
}
  0x22   :  { %33 = dma.hbm_to_vmem [thread:$0]  %s252_s1, 256, %s28_s24, [#allocation6], %s196_s19, %s196_s19, %s197_s20  }
  0x23   :  { %189 = dma.done.wait [#allocation3], 256  }
  0x24   :  { %190 = vsyncadd [#allocation3], 4294967040 }
  0x25   :  { %191 = dma.done.wait [#allocation6], 256  }
  0x26   :  { %192 = vsyncadd [#allocation6], 4294967040  ;;  %v40_v0 = vld [vmem:[#allocation2] sm:$0xff]  ;;  %v41_v1 = vld [vmem:[#allocation2 + $0x8] sm:$0xff]  ;;  %v78_v30 = vlaneseq  ;;  %s199_s1 = smov [#allocation7]   ;;  %vm89_vm0 = vcmask 130112  }
  0x27   :  { %v48_v2 = vmax.f32 %v40_v0, 1e-07  ;;  %v49_v3 = vmax.f32 %v41_v1, 1e-07  ;;  %v42_v8 = vld [vmem:[#allocation5] sm:$0xff]  ;;  %v43_v9 = vld [vmem:[#allocation5 + $0x8] sm:$0xff] }
  0x28   :  { %v44_v10 = vmul.f32 0.85, %v42_v8  ;;  %v45_v12 = vmul.f32 0.85, %v43_v9  ;;  %v79_v31 = vand.u32 127, %v78_v30  ;;  %v81_v32 = vshrl.u32 %v78_v30, 7 }
  0x29   :  { %v50_v4 = vmin.f32 %v48_v2, 0.9999999  ;;  %v51_v5 = vmin.f32 %v49_v3, 0.9999999  ;;  %s100_s6 = sshll.u32 %s199_s1, 4  ;;  %vm92_vm1 = vcmask 122880   ;;  %s101_s6 = int_to_ptr.vmem [resolvable:$true] %s100_s6 }
  0x2a   :  { %v46_v18 = vadd.f32 0.05, %v44_v10  ;;  %v47_v20 = vadd.f32 0.05, %v45_v12  ;;  %v84_v33 = vadd.s32 4294967288, %v79_v31  ;;  %v82_v35 = vsub.s32 %v79_v31, %v81_v32  ;;  %s167_s7 = scalar_lea.vmem %s101_s6, 16  ;;  %p172_p3 = scmp.lt.s32.totalorder %s101_s6, %s101_s6 }
  0x2b   :  { %115 = vlog2.f32 %v50_v4  ;;  %v56_v6 = vsub.f32 1.0, %v50_v4  ;;  %v57_v7 = vsub.f32 1.0, %v51_v5  ;;  %p168_p2 = scmp.ne.s32.totalorder %s101_s6, %s167_s7  ;;  %s171_s8 = scalar_lea.vmem %s101_s6, 32 }
  0x2c   :  { %117 = vlog2.f32 %v51_v5  ;;  %v87_v37 = vsub.s32 %v84_v33, %v81_v32  ;;  %p173_p4 = scmp.lt.s32.totalorder %s171_s8, %s167_s7 }
  0x2d   :  { %119 = vlog2.f32 %v56_v6 }
  0x2e   :  { %121 = vlog2.f32 %v57_v7  ;;  %p174_p5 = por %p173_p4, %p172_p3 }
  0x30   :  { %p175_p6 = pnand %p174_p5, %p168_p2 }
  0x35   :  { %v116_v11 = vpop.eup %115 }
  0x36   :  { %v118_v13 = vpop.eup %117  ;;  %v53_v14 = vmul.f32 0.6931472, %v116_v11 }
  0x37   :  { %v120_v15 = vpop.eup %119  ;;  %v55_v16 = vmul.f32 0.6931472, %v118_v13 }
  0x38   :  { %v122_v17 = vpop.eup %121  ;;  %v59_v19 = vmul.f32 0.6931472, %v120_v15 }
  0x39   :  { %v61_v21 = vmul.f32 0.6931472, %v122_v17 }
  0x3a   :  { %v62_v22 = vsub.f32 %v53_v14, %v59_v19 }
  0x3b   :  { %v63_v23 = vsub.f32 %v55_v16, %v61_v21 }
  0x3c   :  { %v64_v24 = vmul.f32 %v62_v22, %v46_v18 }
  0x3d   :  { %v65_v25 = vmul.f32 %v63_v23, %v47_v20 }
  0x3e   :  { %v66_v26 = vadd.f32 %v64_v24, %v59_v19 }
  0x3f   :  { %v67_v27 = vadd.f32 %v65_v25, %v61_v21 }
  0x40   :  { %v68_v28 = vsub.f32 0.0, %v66_v26 }
  0x41   :  { %v69_v29 = vsub.f32 0.0, %v67_v27 }
  0x42   :  { %70 = vadd.xlane.f32.xlu0 %v68_v28 }
  0x46   :  { %72 = vadd.xlane.f32.xlu0 %v69_v29 }
  0xcf   :  { %v71_v34 = vpop.xlane.xlu0 %70 }
  0xd0   :  { %v74_v36 = vmul.f32 0.0078125, %v71_v34 }
  0xd2   :  { %v83_v40 = vrot.slane %v74_v36, %v82_v35 }
  0xd3   :  { %v73_v38 = vpop.xlane.xlu0 %72 }
  0xd4   :  { %v75_v39 = vmul.f32 0.0078125, %v73_v38 }
  0xd6   :  { %v88_v41 = vrot.slane %v75_v39, %v87_v37 }
  0xd8   :  { %v90_v42 = vsel %vm89_vm0, %v88_v41, %v83_v40 }
  0xd9   :  { %93 = vst.msk [vmem:[#allocation7] sm:$0x1] %vm92_vm1, %v90_v42 }
  0xda   :  { %178 = shalt.err (!%p175_p6)
}
  0xdb   :  { %s179_s11 = scalar_lea.hbm %s253_s2, 16 }
  0xdc   :  { %p180_p7 = scmp.ne.s32.totalorder %s253_s2, %s179_s11  ;;  %p183_p8 = scmp.lt.u32.totalorder %s179_s11, %s253_s2 }
  0xde   :  { %p185_p9 = pnand %p183_p8, %p180_p7 }
  0xe0   :  { %188 = shalt.err (!%p185_p9)
}
  0xe1   :  { %103 = dma.vmem_to_hbm [thread:$0]  %s101_s6, 16, %s253_s2, [#allocation4]  }
  0xe2   :  { %193 = dma.done.wait [#allocation4], 16  }
  0xe3   :  { %194 = vsyncadd [#allocation4], 4294967280 }
  0xe4   :  { %107 = vsyncpa [#allocation3], 1 }
  0xe5   :  { %108 = vsyncpa [#allocation6], 1 }
  0xe6   :  { %109 = vsyncpa [#allocation4], 1 }

</bundles_post_ra>
